<compile_context>
chip_gen: v5e
topology: v5e:2x2
jax: 0.10.0
libtpu: 0.0.40
codegen_flags: <defaults>
</compile_context>

<pallas_src>
import functools

import jax
import jax.numpy as jnp
import numpy as np
from jax.experimental import pallas as pl
from jax.experimental.pallas import tpu as pltpu


def _round_up(v: int, m: int) -> int:
    return (v + m - 1) // m * m


def _approximator_kernel(
    x_ref,      # (tile_n, in_p)   bf16
    w_in_ref,   # (in_p, h_p)      bf16
    b_in_ref,   # (1, h_p)         f32
    vec_ref,    # (2, h_p)         f32   row0 = RMSNorm scale, row1 = b2 (this layer)
    b1_ref,     # (1, tk)          f32   (this layer, this hidden chunk)
    w1_ref,     # (h_p, tk)        bf16  (this layer, this hidden chunk)
    w2_ref,     # (tk, h_p)        bf16  (this layer, this hidden chunk)
    w_out_ref,  # (h_p, out_p)     bf16
    b_out_ref,  # (1, out_p)       f32
    o_ref,      # (tile_n, out_p)
    h_ref,      # scratch (tile_n, h_p) f32   running activation
    xn_ref,     # scratch (tile_n, h_p) bf16  normalized MLP input
    acc_ref,    # scratch (tile_n, h_p) f32   MLP output accumulator
    *,
    hidden_true: int,
    eps: float,
):
    layer = pl.program_id(1)
    chunk = pl.program_id(2)
    n_layers = pl.num_programs(1)
    n_chunks = pl.num_programs(2)

    # ---- layer 0, chunk 0: in_proj into the f32 running activation --------
    @pl.when((layer == 0) & (chunk == 0))
    def _():
        h_ref[...] = (
            jnp.dot(x_ref[...], w_in_ref[...], preferred_element_type=jnp.float32)
            + b_in_ref[...]
        )

    # ---- chunk 0 of every layer: RMSNorm -> bf16 LHS, reset accumulator ----
    @pl.when(chunk == 0)
    def _():
        h = h_ref[...]
        # Padded lanes of h are exactly zero, so sum / hidden_true is the true mean.
        inv_hidden = 1.0 / float(hidden_true)
        rms = jax.lax.rsqrt(jnp.sum(h * h, axis=-1, keepdims=True) * inv_hidden + eps)
        xn_ref[...] = (h * rms * vec_ref[0:1, :]).astype(jnp.bfloat16)
        acc_ref[...] = jnp.zeros_like(acc_ref)

    # ---- every chunk: columns [c*tk,(c+1)*tk) of in_layer, rows of out_layer
    t = (
        jnp.dot(xn_ref[...], w1_ref[...], preferred_element_type=jnp.float32)
        + b1_ref[...]
    )
    t = t * jax.nn.sigmoid(t)                               # SiLU in f32
    acc_ref[...] += jnp.dot(
        t.astype(jnp.bfloat16), w2_ref[...], preferred_element_type=jnp.float32
    )

    is_last_chunk = chunk == n_chunks - 1

    # ---- residual writeback (skipped on the final layer: dead store) ------
    @pl.when(is_last_chunk & (layer != n_layers - 1))
    def _():
        h_ref[...] = h_ref[...] + acc_ref[...] + vec_ref[1:2, :]

    # ---- final layer: out_proj from the local value ------------------------
    @pl.when(is_last_chunk & (layer == n_layers - 1))
    def _():
        h_new = h_ref[...] + acc_ref[...] + vec_ref[1:2, :]
        out = (
            jnp.dot(h_new.astype(jnp.bfloat16), w_out_ref[...],
                    preferred_element_type=jnp.float32)
            + b_out_ref[...]
        )
        o_ref[...] = out.astype(o_ref.dtype)


def approximator_forward(x, params, *, n_layers: int, tile_n=None,
                         chunk_k: int = 512, eps: float = 1e-6):
    """x: (batch, seq, in_dim) float32. Returns (batch, seq, out_dim)."""
    batch, seq, in_dim = x.shape
    hidden = params["w_in"].shape[1]
    out_dim = params["w_out"].shape[1]

    n = batch * seq
    in_p = _round_up(in_dim, 128)
    h_p = _round_up(hidden, 128)
    out_p = _round_up(out_dim, 128)

    # --- generation-aware VMEM budget (48 MiB on v7x, 96 MiB on v5e/v6e) ----
    try:
        vmem_cap = int(pltpu.get_tpu_info().vmem_capacity_bytes)
    except Exception:
        vmem_cap = 64 * 1024 * 1024        # conservative (v7x per-core VMEM)
    vmem_budget = max(32 * 1024 * 1024, int(0.75 * vmem_cap))

    # --- legalizers for the tunables ----------------------------------------
    n_eff = _round_up(max(n, 1), 16)

    def legal_tk(t):
        t = max(128, min((t // 128) * 128, h_p))
        while h_p % t:                      # h_p is a multiple of 128 -> terminates
            t -= 128
        return t

    def legal_tn(t):
        t = max(16, min(_round_up(t, 16), n_eff))
        if n_eff >= 32:                     # keep >= 2 row tiles (2nd TC / megacore)
            t = min(t, max(16, (n_eff // 32) * 16))
        return t

    def vmem_footprint(tn, tk):
        return (
            2 * tn * in_p * 2                    # x tile (bf16), double-buffered
            + 2 * tn * out_p * 4                 # out tile (f32), double-buffered
            + (in_p * h_p * 2 + h_p * 4)         # w_in / b_in, single-buffered
            + (h_p * out_p * 2 + out_p * 4)      # w_out / b_out, single-buffered
            + 2 * (2 * h_p * 4)                  # (scale,b2) per layer, double-buffered
            + 2 * (tk * 4)                       # b1 chunk, double-buffered
            + 2 * (h_p * tk * 2)                 # w1 chunk (bf16), double-buffered
            + 2 * (tk * h_p * 2)                 # w2 chunk (bf16), double-buffered
            + tn * h_p * 4                       # h scratch (f32)
            + tn * h_p * 2                       # xn scratch (bf16)
            + tn * h_p * 4                       # acc scratch (f32)
        )

    # Pick (tile_n, tk): largest tile_n first (arithmetic intensity), then the
    # largest chunk that still fits the budget.
    tn_candidates = (512, 384, 256, 128, 64, 32, 16) if tile_n is None else (int(tile_n), 16)
    tk_candidates = (chunk_k, 256, 128)
    sel = None
    for tn_c in tn_candidates:
        for tk_c in tk_candidates:
            tn, tk = legal_tn(tn_c), legal_tk(tk_c)
            if vmem_footprint(tn, tk) <= int(0.9 * vmem_budget):
                sel = (tn, tk)
                break
        if sel is not None:
            break
    if sel is None:
        sel = (legal_tn(16), legal_tk(128))
    tile_n, tk = sel

    n_pad = _round_up(n_eff, tile_n)
    n_chunks = h_p // tk
    n_row_tiles = n_pad // tile_n

    # --- pad & cast parameters (weights -> bf16, biases/scales -> f32) ------
    def pad2(a, r, c, dt):
        a = a.astype(dt)
        return jnp.pad(a, ((0, r - a.shape[0]), (0, c - a.shape[1])))

    def pad3(a, r, c, dt):
        a = a.astype(dt)
        return jnp.pad(a, ((0, 0), (0, r - a.shape[1]), (0, c - a.shape[2])))

    w_in = pad2(params["w_in"], in_p, h_p, jnp.bfloat16)
    b_in = pad2(params["b_in"], 1, h_p, jnp.float32)
    w1 = pad3(params["w1"], h_p, h_p, jnp.bfloat16)
    w2 = pad3(params["w2"], h_p, h_p, jnp.bfloat16)
    b1 = pad3(params["b1"], 1, h_p, jnp.float32)
    # Pack (RMSNorm scale, b2) into one (n_layers, 2, h_p) array -> 1 DMA / layer.
    vecs = jnp.concatenate(
        [params["nscale"].astype(jnp.float32), params["b2"].astype(jnp.float32)],
        axis=1,
    )
    vecs = jnp.pad(vecs, ((0, 0), (0, 0), (0, h_p - vecs.shape[2])))
    w_out = pad2(params["w_out"], h_p, out_p, jnp.bfloat16)
    b_out = pad2(params["b_out"], 1, out_p, jnp.float32)

    # bf16 input rows (halves x HBM traffic; 16-row sublane packing).
    x2d = x.reshape(n, in_dim).astype(jnp.bfloat16)
    x2d = jnp.pad(x2d, ((0, n_pad - n), (0, in_p - in_dim)))

    grid = (n_row_tiles, n_layers, n_chunks)

    # --- advisory cost estimate (weights re-streamed once per row tile) -----
    flops = 2 * n_pad * (in_p * h_p + 2 * n_layers * h_p * h_p + h_p * out_p)
    transcendentals = n_pad * n_layers * (h_p + 1)          # sigmoid + rsqrt
    bytes_accessed = int(
        x2d.size * 2 + n_pad * out_p * 4
        + (w_in.size + w_out.size) * 2 + (b_in.size + b_out.size) * 4
        + n_row_tiles * ((w1.size + w2.size) * 2 + (b1.size + vecs.size) * 4)
    )

    kernel = functools.partial(_approximator_kernel, hidden_true=hidden, eps=eps)

    out2d = pl.pallas_call(
        kernel,
        out_shape=jax.ShapeDtypeStruct((n_pad, out_p), x.dtype),
        grid_spec=pltpu.PrefetchScalarGridSpec(
            num_scalar_prefetch=0,
            grid=grid,
            in_specs=[
                # x rows: depends only on the row-tile index.
                pl.BlockSpec((tile_n, in_p), lambda i, l, c: (i, 0)),
                # Constant-index operands: single-buffered (DMA'd once).
                pl.BlockSpec((in_p, h_p), lambda i, l, c: (0, 0),
                             pipeline_mode=pl.Buffered(1)),
                pl.BlockSpec((1, h_p), lambda i, l, c: (0, 0),
                             pipeline_mode=pl.Buffered(1)),
                # Per-layer small vectors: (scale, b2) packed, fetched per layer.
                pl.BlockSpec((pl.Squeezed(), 2, h_p), lambda i, l, c: (l, 0, 0)),
                # Per-layer, per-chunk streamed blocks.
                pl.BlockSpec((pl.Squeezed(), 1, tk), lambda i, l, c: (l, 0, c)),
                pl.BlockSpec((pl.Squeezed(), h_p, tk), lambda i, l, c: (l, 0, c)),
                pl.BlockSpec((pl.Squeezed(), tk, h_p), lambda i, l, c: (l, c, 0)),
                # Constant-index out_proj params: single-buffered.
                pl.BlockSpec((h_p, out_p), lambda i, l, c: (0, 0),
                             pipeline_mode=pl.Buffered(1)),
                pl.BlockSpec((1, out_p), lambda i, l, c: (0, 0),
                             pipeline_mode=pl.Buffered(1)),
            ],
            out_specs=pl.BlockSpec((tile_n, out_p), lambda i, l, c: (i, 0)),
            scratch_shapes=[
                pltpu.VMEM((tile_n, h_p), jnp.float32),   # h (running activation)
                pltpu.VMEM((tile_n, h_p), jnp.bfloat16),  # xn (normalized MLP input)
                pltpu.VMEM((tile_n, h_p), jnp.float32),   # acc (MLP output)
            ],
        ),
        compiler_params=pltpu.CompilerParams(
            dimension_semantics=("parallel", "arbitrary", "arbitrary"),
            vmem_limit_bytes=vmem_budget,
        ),
        cost_estimate=pl.CostEstimate(
            flops=flops,
            transcendentals=transcendentals,
            bytes_accessed=bytes_accessed,
        ),
    )(
        x2d,
        w_in, b_in,
        vecs,
        b1, w1, w2,
        w_out, b_out,
    )

    return out2d[:n, :out_dim].reshape(batch, seq, out_dim)


def _init_params(key, in_dim, hidden, out_dim, n_layers):
    ks = jax.random.split(key, 8)
    s = 0.05
    return {
        "w_in":   s * jax.random.normal(ks[0], (in_dim, hidden), jnp.float32),
        "b_in":   s * jax.random.normal(ks[1], (1, hidden), jnp.float32),
        "nscale": 1.0 + s * jax.random.normal(ks[2], (n_layers, 1, hidden), jnp.float32),
        "w1":     s * jax.random.normal(ks[3], (n_layers, hidden, hidden), jnp.float32),
        "b1":     s * jax.random.normal(ks[4], (n_layers, 1, hidden), jnp.float32),
        "w2":     s * jax.random.normal(ks[5], (n_layers, hidden, hidden), jnp.float32),
        "b2":     s * jax.random.normal(ks[6], (n_layers, 1, hidden), jnp.float32),
        "w_out":  s * jax.random.normal(ks[7], (hidden, out_dim), jnp.float32),
        "b_out":  jnp.zeros((1, out_dim), jnp.float32),
    }


def _reference_forward(x2d, params, n_layers, eps=1e-6):
    """Pure-JAX reference matching the PyTorch module semantics, with the same
    bf16-MXU / f32-accumulate precision policy as the kernel."""
    def bdot(a, w):
        return jnp.dot(a.astype(jnp.bfloat16), w.astype(jnp.bfloat16),
                       preferred_element_type=jnp.float32)

    h = bdot(x2d, params["w_in"]) + params["b_in"]
    for i in range(n_layers):
        rms = jax.lax.rsqrt(jnp.mean(h * h, axis=-1, keepdims=True) + eps)
        xn = h * rms * params["nscale"][i]
        t = bdot(xn, params["w1"][i]) + params["b1"][i]
        t = t * jax.nn.sigmoid(t)
        t = bdot(t, params["w2"][i]) + params["b2"][i]
        h = h + t
    return bdot(h, params["w_out"]) + params["b_out"]


if __name__ == "__main__":
    # Small demo shapes: batch=2, seq=8, in_dim=16, hidden=64, out_dim=32, n_layers=5
    batch, seq, in_dim, hidden, out_dim, n_layers = 2, 8, 16, 64, 32, 5

    key = jax.random.PRNGKey(0)
    kx, kp = jax.random.split(key)
    x = jax.random.normal(kx, (batch, seq, in_dim), jnp.float32)
    params = _init_params(kp, in_dim, hidden, out_dim, n_layers)

    out = approximator_forward(x, params, n_layers=n_layers)
    out = jax.block_until_ready(out)

    ref = _reference_forward(x.reshape(-1, in_dim), params, n_layers).reshape(
        batch, seq, out_dim
    )
    np.testing.assert_allclose(np.asarray(out), np.asarray(ref),
                               rtol=2e-3, atol=2e-3)

    print("KERNEL_OK")
</pallas_src>

<mosaic_0001>
module attributes {stable_mosaic.version = 11 : i64} {
  func.func @_approximator_kernel(%arg0: i32, %arg1: i32, %arg2: i32, %arg3: memref<16x128xbf16, #tpu.memory_space<vmem>>, %arg4: memref<128x128xbf16, #tpu.memory_space<vmem>>, %arg5: memref<1x128xf32, #tpu.memory_space<vmem>>, %arg6: memref<1x2x128xf32, #tpu.memory_space<vmem>>, %arg7: memref<1x1x128xf32, #tpu.memory_space<vmem>>, %arg8: memref<1x128x128xbf16, #tpu.memory_space<vmem>>, %arg9: memref<1x128x128xbf16, #tpu.memory_space<vmem>>, %arg10: memref<128x128xbf16, #tpu.memory_space<vmem>>, %arg11: memref<1x128xf32, #tpu.memory_space<vmem>>, %arg12: memref<16x128xf32, #tpu.memory_space<vmem>>, %arg13: memref<16x128xf32, #tpu.memory_space<vmem>>, %arg14: memref<16x128xbf16, #tpu.memory_space<vmem>>, %arg15: memref<16x128xf32, #tpu.memory_space<vmem>>) attributes {dimension_semantics = [#tpu.dimension_semantics<parallel>, #tpu.dimension_semantics<arbitrary>, #tpu.dimension_semantics<arbitrary>], iteration_bounds = array<i64: 1, 5, 1>, scalar_prefetch = 0 : i64, scratch_operands = 3 : i64, tpu.core_type = #tpu.core_type<tc>, window_params = [{transform_indices = @transform_0, window_bounds = array<i64: 16, 128>}, {pipeline_mode = #tpu.pipeline_mode<synchronous>, transform_indices = @transform_1, window_bounds = array<i64: 128, 128>}, {pipeline_mode = #tpu.pipeline_mode<synchronous>, transform_indices = @transform_2, window_bounds = array<i64: 1, 128>}, {transform_indices = @transform_3, window_bounds = array<i64: 1, 2, 128>}, {transform_indices = @transform_4, window_bounds = array<i64: 1, 1, 128>}, {transform_indices = @transform_5, window_bounds = array<i64: 1, 128, 128>}, {transform_indices = @transform_6, window_bounds = array<i64: 1, 128, 128>}, {pipeline_mode = #tpu.pipeline_mode<synchronous>, transform_indices = @transform_7, window_bounds = array<i64: 128, 128>}, {pipeline_mode = #tpu.pipeline_mode<synchronous>, transform_indices = @transform_8, window_bounds = array<i64: 1, 128>}, {transform_indices = @transform_9, window_bounds = array<i64: 16, 128>}]} {
    %c0_i32 = arith.constant 0 : i32
    %0 = arith.cmpi eq, %arg1, %c0_i32 : i32
    %c0_i32_0 = arith.constant 0 : i32
    %1 = arith.cmpi eq, %arg2, %c0_i32_0 : i32
    %2 = arith.andi %0, %1 : i1
    %3 = arith.extui %2 : i1 to i32
    %c0_i32_1 = arith.constant 0 : i32
    %4 = arith.cmpi ne, %3, %c0_i32_1 : i32
    scf.if %4 {
      %c0_24 = arith.constant 0 : index
      %c0_25 = arith.constant 0 : index
      %38 = vector.load %arg3[%c0_24, %c0_25] : memref<16x128xbf16, #tpu.memory_space<vmem>>, vector<16x128xbf16>
      %c0_26 = arith.constant 0 : index
      %c0_27 = arith.constant 0 : index
      %39 = vector.load %arg4[%c0_26, %c0_27] : memref<128x128xbf16, #tpu.memory_space<vmem>>, vector<128x128xbf16>
      %cst_28 = arith.constant dense<0.000000e+00> : vector<16x128xf32>
      %40 = tpu.matmul %38, %39, %cst_28 {dimension_numbers = #tpu.dot_dimension_numbers<[1], [0], [0], [1], [0, 0, 1, 1], [], []>} : vector<16x128xbf16>, vector<128x128xbf16>, vector<16x128xf32> -> vector<16x128xf32>
      %c0_29 = arith.constant 0 : index
      %c0_30 = arith.constant 0 : index
      %41 = vector.load %arg5[%c0_29, %c0_30] : memref<1x128xf32, #tpu.memory_space<vmem>>, vector<1x128xf32>
      %42 = vector.broadcast %41 : vector<1x128xf32> to vector<16x128xf32>
      %43 = arith.addf %40, %42 : vector<16x128xf32>
      %c0_31 = arith.constant 0 : index
      %c0_32 = arith.constant 0 : index
      %44 = vector.load %arg13[%c0_31, %c0_32] : memref<16x128xf32, #tpu.memory_space<vmem>>, vector<16x128xf32>
      tpu.vector_store %arg13[%c0_31, %c0_32], %43 {strides = array<i32>} : memref<16x128xf32, #tpu.memory_space<vmem>>, vector<16x128xf32>,
    } else {
    }
    %c0_i32_2 = arith.constant 0 : i32
    %5 = arith.cmpi eq, %arg2, %c0_i32_2 : i32
    %6 = arith.extui %5 : i1 to i32
    %c0_i32_3 = arith.constant 0 : i32
    %7 = arith.cmpi ne, %6, %c0_i32_3 : i32
    scf.if %7 {
      %c0_24 = arith.constant 0 : index
      %c0_25 = arith.constant 0 : index
      %38 = vector.load %arg13[%c0_24, %c0_25] : memref<16x128xf32, #tpu.memory_space<vmem>>, vector<16x128xf32>
      %39 = arith.mulf %38, %38 : vector<16x128xf32>
      %cst_26 = arith.constant dense<0.000000e+00> : vector<16xf32>
      %40 = vector.multi_reduction <add>, %39, %cst_26 [1] : vector<16x128xf32> to vector<16xf32>
      %41 = vector.shape_cast %40 : vector<16xf32> to vector<16x1xf32>
      %cst_27 = arith.constant 1.562500e-02 : f32
      %42 = vector.broadcast %cst_27 : f32 to vector<16x1xf32>
      %43 = arith.mulf %41, %42 : vector<16x1xf32>
      %cst_28 = arith.constant 9.99999997E-7 : f32
      %44 = vector.broadcast %cst_28 : f32 to vector<16x1xf32>
      %45 = arith.addf %43, %44 : vector<16x1xf32>
      %46 = math.rsqrt %45 : vector<16x1xf32>
      %47 = vector.broadcast %46 : vector<16x1xf32> to vector<16x128xf32>
      %48 = arith.mulf %38, %47 : vector<16x128xf32>
      %c0_29 = arith.constant 0 : index
      %c0_30 = arith.constant 0 : index
      %c0_31 = arith.constant 0 : index
      %49 = vector.load %arg6[%c0_29, %c0_30, %c0_31] : memref<1x2x128xf32, #tpu.memory_space<vmem>>, vector<1x1x128xf32>
      %50 = vector.shape_cast %49 : vector<1x1x128xf32> to vector<1x128xf32>
      %51 = vector.broadcast %50 : vector<1x128xf32> to vector<16x128xf32>
      %52 = arith.mulf %48, %51 : vector<16x128xf32>
      %53 = arith.truncf %52 : vector<16x128xf32> to vector<16x128xbf16>
      %c0_32 = arith.constant 0 : index
      %c0_33 = arith.constant 0 : index
      %54 = vector.load %arg14[%c0_32, %c0_33] : memref<16x128xbf16, #tpu.memory_space<vmem>>, vector<16x128xbf16>
      tpu.vector_store %arg14[%c0_32, %c0_33], %53 {strides = array<i32>} : memref<16x128xbf16, #tpu.memory_space<vmem>>, vector<16x128xbf16>,
      %cst_34 = arith.constant 0.000000e+00 : f32
      %55 = vector.broadcast %cst_34 : f32 to vector<16x128xf32>
      %c0_35 = arith.constant 0 : index
      %c0_36 = arith.constant 0 : index
      %56 = vector.load %arg15[%c0_35, %c0_36] : memref<16x128xf32, #tpu.memory_space<vmem>>, vector<16x128xf32>
      tpu.vector_store %arg15[%c0_35, %c0_36], %55 {strides = array<i32>} : memref<16x128xf32, #tpu.memory_space<vmem>>, vector<16x128xf32>,
    } else {
    }
    %c0 = arith.constant 0 : index
    %c0_4 = arith.constant 0 : index
    %8 = vector.load %arg14[%c0, %c0_4] : memref<16x128xbf16, #tpu.memory_space<vmem>>, vector<16x128xbf16>
    %c0_5 = arith.constant 0 : index
    %c0_6 = arith.constant 0 : index
    %c0_7 = arith.constant 0 : index
    %9 = vector.load %arg8[%c0_5, %c0_6, %c0_7] : memref<1x128x128xbf16, #tpu.memory_space<vmem>>, vector<1x128x128xbf16>
    %10 = vector.shape_cast %9 : vector<1x128x128xbf16> to vector<128x128xbf16>
    %cst = arith.constant dense<0.000000e+00> : vector<16x128xf32>
    %11 = tpu.matmul %8, %10, %cst {dimension_numbers = #tpu.dot_dimension_numbers<[1], [0], [0], [1], [0, 0, 1, 1], [], []>} : vector<16x128xbf16>, vector<128x128xbf16>, vector<16x128xf32> -> vector<16x128xf32>
    %c0_8 = arith.constant 0 : index
    %c0_9 = arith.constant 0 : index
    %c0_10 = arith.constant 0 : index
    %12 = vector.load %arg7[%c0_8, %c0_9, %c0_10] : memref<1x1x128xf32, #tpu.memory_space<vmem>>, vector<1x1x128xf32>
    %13 = vector.shape_cast %12 : vector<1x1x128xf32> to vector<1x128xf32>
    %14 = vector.broadcast %13 : vector<1x128xf32> to vector<16x128xf32>
    %15 = arith.addf %11, %14 : vector<16x128xf32>
    %16 = arith.negf %15 : vector<16x128xf32>
    %17 = math.exp %16 : vector<16x128xf32>
    %cst_11 = arith.constant 1.000000e+00 : f32
    %18 = vector.broadcast %cst_11 : f32 to vector<16x128xf32>
    %19 = arith.addf %18, %17 : vector<16x128xf32>
    %20 = arith.divf %18, %19 : vector<16x128xf32>
    %21 = arith.mulf %15, %20 : vector<16x128xf32>
    %c0_12 = arith.constant 0 : index
    %c0_13 = arith.constant 0 : index
    %22 = vector.load %arg15[%c0_12, %c0_13] : memref<16x128xf32, #tpu.memory_space<vmem>>, vector<16x128xf32>
    %23 = arith.truncf %21 : vector<16x128xf32> to vector<16x128xbf16>
    %c0_14 = arith.constant 0 : index
    %c0_15 = arith.constant 0 : index
    %c0_16 = arith.constant 0 : index
    %24 = vector.load %arg9[%c0_14, %c0_15, %c0_16] : memref<1x128x128xbf16, #tpu.memory_space<vmem>>, vector<1x128x128xbf16>
    %25 = vector.shape_cast %24 : vector<1x128x128xbf16> to vector<128x128xbf16>
    %cst_17 = arith.constant dense<0.000000e+00> : vector<16x128xf32>
    %26 = tpu.matmul %23, %25, %cst_17 {dimension_numbers = #tpu.dot_dimension_numbers<[1], [0], [0], [1], [0, 0, 1, 1], [], []>} : vector<16x128xbf16>, vector<128x128xbf16>, vector<16x128xf32> -> vector<16x128xf32>
    %27 = arith.addf %22, %26 : vector<16x128xf32>
    %c0_18 = arith.constant 0 : index
    %c0_19 = arith.constant 0 : index
    %28 = vector.load %arg15[%c0_18, %c0_19] : memref<16x128xf32, #tpu.memory_space<vmem>>, vector<16x128xf32>
    tpu.vector_store %arg15[%c0_18, %c0_19], %27 {strides = array<i32>} : memref<16x128xf32, #tpu.memory_space<vmem>>, vector<16x128xf32>,
    %c0_i32_20 = arith.constant 0 : i32
    %29 = arith.cmpi eq, %arg2, %c0_i32_20 : i32
    %c4_i32 = arith.constant 4 : i32
    %30 = arith.cmpi ne, %arg1, %c4_i32 : i32
    %31 = arith.andi %29, %30 : i1
    %32 = arith.extui %31 : i1 to i32
    %c0_i32_21 = arith.constant 0 : i32
    %33 = arith.cmpi ne, %32, %c0_i32_21 : i32
    scf.if %33 {
      %c0_24 = arith.constant 0 : index
      %c0_25 = arith.constant 0 : index
      %38 = vector.load %arg13[%c0_24, %c0_25] : memref<16x128xf32, #tpu.memory_space<vmem>>, vector<16x128xf32>
      %c0_26 = arith.constant 0 : index
      %c0_27 = arith.constant 0 : index
      %39 = vector.load %arg15[%c0_26, %c0_27] : memref<16x128xf32, #tpu.memory_space<vmem>>, vector<16x128xf32>
      %40 = arith.addf %38, %39 : vector<16x128xf32>
      %c0_28 = arith.constant 0 : index
      %c1 = arith.constant 1 : index
      %c0_29 = arith.constant 0 : index
      %41 = vector.load %arg6[%c0_28, %c1, %c0_29] : memref<1x2x128xf32, #tpu.memory_space<vmem>>, vector<1x1x128xf32>
      %42 = vector.shape_cast %41 : vector<1x1x128xf32> to vector<1x128xf32>
      %43 = vector.broadcast %42 : vector<1x128xf32> to vector<16x128xf32>
      %44 = arith.addf %40, %43 : vector<16x128xf32>
      %c0_30 = arith.constant 0 : index
      %c0_31 = arith.constant 0 : index
      %45 = vector.load %arg13[%c0_30, %c0_31] : memref<16x128xf32, #tpu.memory_space<vmem>>, vector<16x128xf32>
      tpu.vector_store %arg13[%c0_30, %c0_31], %44 {strides = array<i32>} : memref<16x128xf32, #tpu.memory_space<vmem>>, vector<16x128xf32>,
    } else {
    }
    %c4_i32_22 = arith.constant 4 : i32
    %34 = arith.cmpi eq, %arg1, %c4_i32_22 : i32
    %35 = arith.andi %29, %34 : i1
    %36 = arith.extui %35 : i1 to i32
    %c0_i32_23 = arith.constant 0 : i32
    %37 = arith.cmpi ne, %36, %c0_i32_23 : i32
    scf.if %37 {
      %c0_24 = arith.constant 0 : index
      %c0_25 = arith.constant 0 : index
      %38 = vector.load %arg13[%c0_24, %c0_25] : memref<16x128xf32, #tpu.memory_space<vmem>>, vector<16x128xf32>
      %c0_26 = arith.constant 0 : index
      %c0_27 = arith.constant 0 : index
      %39 = vector.load %arg15[%c0_26, %c0_27] : memref<16x128xf32, #tpu.memory_space<vmem>>, vector<16x128xf32>
      %40 = arith.addf %38, %39 : vector<16x128xf32>
      %c0_28 = arith.constant 0 : index
      %c1 = arith.constant 1 : index
      %c0_29 = arith.constant 0 : index
      %41 = vector.load %arg6[%c0_28, %c1, %c0_29] : memref<1x2x128xf32, #tpu.memory_space<vmem>>, vector<1x1x128xf32>
      %42 = vector.shape_cast %41 : vector<1x1x128xf32> to vector<1x128xf32>
      %43 = vector.broadcast %42 : vector<1x128xf32> to vector<16x128xf32>
      %44 = arith.addf %40, %43 : vector<16x128xf32>
      %45 = arith.truncf %44 : vector<16x128xf32> to vector<16x128xbf16>
      %c0_30 = arith.constant 0 : index
      %c0_31 = arith.constant 0 : index
      %46 = vector.load %arg10[%c0_30, %c0_31] : memref<128x128xbf16, #tpu.memory_space<vmem>>, vector<128x128xbf16>
      %cst_32 = arith.constant dense<0.000000e+00> : vector<16x128xf32>
      %47 = tpu.matmul %45, %46, %cst_32 {dimension_numbers = #tpu.dot_dimension_numbers<[1], [0], [0], [1], [0, 0, 1, 1], [], []>} : vector<16x128xbf16>, vector<128x128xbf16>, vector<16x128xf32> -> vector<16x128xf32>
      %c0_33 = arith.constant 0 : index
      %c0_34 = arith.constant 0 : index
      %48 = vector.load %arg11[%c0_33, %c0_34] : memref<1x128xf32, #tpu.memory_space<vmem>>, vector<1x128xf32>
      %49 = vector.broadcast %48 : vector<1x128xf32> to vector<16x128xf32>
      %50 = arith.addf %47, %49 : vector<16x128xf32>
      %c0_35 = arith.constant 0 : index
      %c0_36 = arith.constant 0 : index
      %51 = vector.load %arg12[%c0_35, %c0_36] : memref<16x128xf32, #tpu.memory_space<vmem>>, vector<16x128xf32>
      tpu.vector_store %arg12[%c0_35, %c0_36], %50 {strides = array<i32>} : memref<16x128xf32, #tpu.memory_space<vmem>>, vector<16x128xf32>,
    } else {
    }
    return
  }
  func.func @transform_0(%arg0: i32, %arg1: i32, %arg2: i32) -> (i32, i32) {
    %c0_i32 = arith.constant 0 : i32
    %c0_i32_0 = arith.constant 0 : i32
    return %arg0, %c0_i32 : i32, i32
  }
  func.func @transform_1(%arg0: i32, %arg1: i32, %arg2: i32) -> (i32, i32) {
    %c0_i32 = arith.constant 0 : i32
    %c0_i32_0 = arith.constant 0 : i32
    %c0_i32_1 = arith.constant 0 : i32
    return %c0_i32, %c0_i32_0 : i32, i32
  }
  func.func @transform_2(%arg0: i32, %arg1: i32, %arg2: i32) -> (i32, i32) {
    %c0_i32 = arith.constant 0 : i32
    %c0_i32_0 = arith.constant 0 : i32
    %c0_i32_1 = arith.constant 0 : i32
    return %c0_i32, %c0_i32_0 : i32, i32
  }
  func.func @transform_3(%arg0: i32, %arg1: i32, %arg2: i32) -> (i32, i32, i32) {
    %c0_i32 = arith.constant 0 : i32
    %c0_i32_0 = arith.constant 0 : i32
    %c0_i32_1 = arith.constant 0 : i32
    return %arg1, %c0_i32, %c0_i32_0 : i32, i32, i32
  }
  func.func @transform_4(%arg0: i32, %arg1: i32, %arg2: i32) -> (i32, i32, i32) {
    %c0_i32 = arith.constant 0 : i32
    %c0_i32_0 = arith.constant 0 : i32
    return %arg1, %c0_i32, %arg2 : i32, i32, i32
  }
  func.func @transform_5(%arg0: i32, %arg1: i32, %arg2: i32) -> (i32, i32, i32) {
    %c0_i32 = arith.constant 0 : i32
    %c0_i32_0 = arith.constant 0 : i32
    return %arg1, %c0_i32, %arg2 : i32, i32, i32
  }
  func.func @transform_6(%arg0: i32, %arg1: i32, %arg2: i32) -> (i32, i32, i32) {
    %c0_i32 = arith.constant 0 : i32
    %c0_i32_0 = arith.constant 0 : i32
    return %arg1, %arg2, %c0_i32 : i32, i32, i32
  }
  func.func @transform_7(%arg0: i32, %arg1: i32, %arg2: i32) -> (i32, i32) {
    %c0_i32 = arith.constant 0 : i32
    %c0_i32_0 = arith.constant 0 : i32
    %c0_i32_1 = arith.constant 0 : i32
    return %c0_i32, %c0_i32_0 : i32, i32
  }
  func.func @transform_8(%arg0: i32, %arg1: i32, %arg2: i32) -> (i32, i32) {
    %c0_i32 = arith.constant 0 : i32
    %c0_i32_0 = arith.constant 0 : i32
    %c0_i32_1 = arith.constant 0 : i32
    return %c0_i32, %c0_i32_0 : i32, i32
  }
  func.func @transform_9(%arg0: i32, %arg1: i32, %arg2: i32) -> (i32, i32) {
    %c0_i32 = arith.constant 0 : i32
    %c0_i32_0 = arith.constant 0 : i32
    return %arg0, %c0_i32 : i32, i32
  }
}

</mosaic_0001>

<bundles_post_ra>
// kernel: tpu_custom_call.1
= control target key start
LH: loop header
LB: loop body
LE: loop exit
PB: predicated region body
PF: predicated region fallthrough
CT: control target
= control target key end

     0   :  { %s2123_s0 = inlined_call_operand.hbm [shape: bf16[16,128], index: 0, kind: input, shape index: {}]   ;;  %s2124_s1 = inlined_call_operand.hbm [shape: bf16[128,128], index: 1, kind: input, shape index: {}]   ;;  %s2125_s2 = inlined_call_operand.vmem [shape: f32[1,128], index: 2, kind: input, shape index: {}]   ;;  %s2126_s3 = inlined_call_operand.hbm [shape: f32[5,2,128], index: 3, kind: input, shape index: {}]   ;;  %s2127_s4 = inlined_call_operand.hbm [shape: f32[5,1,128], index: 4, kind: input, shape index: {}]   ;;  %s2128_s5 = inlined_call_operand.hbm [shape: bf16[5,128,128], index: 5, kind: input, shape index: {}]   ;;  %s2129_s6 = inlined_call_operand.hbm [shape: bf16[5,128,128], index: 6, kind: input, shape index: {}]   ;;  %s2130_s7 = inlined_call_operand.hbm [shape: bf16[128,128], index: 7, kind: input, shape index: {}]   ;;  %s2131_s8 = inlined_call_operand.vmem [shape: f32[1,128], index: 8, kind: input, shape index: {}]   ;;  %s2132_s9 = inlined_call_operand.hbm [shape: f32[16,128], index: 9, kind: output, shape index: {}]  }
   0x1   :  { %2139 = sst [smem:[#allocation24_spill]] %s2123_s0 }
   0x2   :  { %2140 = sst [smem:[#allocation25_spill]] %s2124_s1 }
   0x3   :  { %2141 = sst [smem:[#allocation26_spill]] %s2126_s3 }
   0x4   :  { %2142 = sst [smem:[#allocation27_spill]] %s2127_s4 }
   0x5   :  { %2143 = sst [smem:[#allocation28_spill]] %s2132_s9 }
   0x6   :  { %14 = vsyncpa [#allocation6], 0 }
   0x7   :  { %15 = vsyncpa [#allocation9], 0 }
   0x8   :  { %16 = vsyncpa [#allocation7], 0  ;;  %s1892_s30 = smov 0   ;;  %s1894_s10 = smov 0  }
   0x9   :  { %s1896_s11 = smov 0   ;;  %s1898_s12 = smov 0  }
   0xa   :  { %s1900_s13 = smov 0   ;;  %s1902_s14 = smov 0  }
   0xb LB: > { %2144 = sst [smem:[#allocation21_spill]] %s1828_s13  ;;  %s1921_s15 = sadd.s32 4294967295, %s1832_s14   ;;  %s1832_s14 = sphi %s1902_s14, %s22_s14   ;;  %s1828_s13 = sphi %s1900_s13, %s2163_s13   ;;  %s1824_s12 = sphi %s1898_s12, %s2162_s12   ;;  %s1820_s11 = sphi %s1896_s11, %s2166_s11   ;;  %s1816_s10 = sphi %s1894_s10, %s2165_s10   ;;  %s1812_s30 = sphi %s1892_s30, %s2164_s30  }
   0xc   : > { %p129_p0 = scmp.ne.s32.totalorder %s1816_s10, %s1812_s30  ;;  %p130_p1 = scmp.eq.s32.totalorder %s1921_s15, 0 }
   0xd   : > { %p1188_p2 = scmp.ge.s32.totalorder %s1832_s14, 1  ;;  %p292_p3 = scmp.lt.s32.totalorder %s1832_s14, 6 }
   0xe   : > { %p1929_p4 = por %p130_p1, %p129_p0  ;;  %s2146_s0 = sld [smem:[#allocation24_spill]] }
   0xf   : > { %p1936_p5 = pnand %p1188_p2, %p292_p3  ;;  %s1834_s21 = smov [#allocation5]  }
  0x10   : > { %s308_s22 = sshll.u32 %s1834_s21, 4  ;;  %s2133_s24 = smov 64   ;;  %s309_s22 = int_to_ptr.vmem [resolvable:$true] %s308_s22 }
  0x11   : > { %p1421_p6 = pneg %p1936_p5  ;;  %s2135_s25 = smov 4  }
  0x12   : > { %s37_s26 = sadd.s32 1, %s1828_s13  ;;  %s116_s27 = sadd.s32 1, %s1820_s11 }
  0x13   : > { %p1944_p7 = pnand %p1421_p6, %p130_p1  ;;  %p39_p8 = scmp.ge.s32.totalorder %s37_s26, 5 }
  0x14   : > { %s306_s19 = sshll.u32 %s2146_s0, 4  ;;  %p123_p9 = scmp.ne.s32.totalorder %s1820_s11, %s1816_s10  ;;  %s307_s19 = int_to_ptr.hbm [resolvable:$true] %s306_s19 }
  0x15   : > { %1424 = dma.hbm_to_vmem [thread:$0]  (!%p1944_p7), %s307_s19, 128, %s309_s22, [#allocation6], %s2133_s24, %s2133_s24, %s2135_s25  }
  0x16   : > { %p124_p10 = scmp.eq.s32.totalorder %s1832_s14, 0  ;;  %s2168_s26 = smov (%p39_p8, %s37_s26), 0 }
  0x17   : > { %2149 = sst [smem:[#allocation22_spill]] %s2168_s26  ;;  %p1447_p12 = scmp.lt.s32.totalorder %s1832_s14, 5 }
  0x18   : > { %p1960_p11 = por %p124_p10, %p123_p9  ;;  %s113_s29 = ssub.s32 %s1828_s13, %s2168_s26 }
  0x19   : > { %s356_s30 = sand.u32 1, %s1832_s14   ;;  %p114_p13 = scmp.eq.s32.totalorder %s113_s29, 0 }
  0x1a   : > { %s1969_s17 = sand.u32 1, %s1820_s11   ;;  %s1194_s18 = sshll.u32 %s1828_s13, 1 }
  0x1b   : > { %s1973_s19 = scalar_select %p114_p13, %s1820_s11, %s116_s27  }
  0x1c   : > { %s1193_s21 = sshll.u32 %s1969_s17, 1  ;;  %s2152_s3 = sld [smem:[#allocation26_spill]] }
  0x1d   : > { %2151 = sst [smem:[#allocation23_spill]] %s1973_s19  ;;  %s360_s9 = scalar_lea.vmem [#allocation10], %s1193_s21 }
  0x1e   : > { %s368_s26 = sshll.u32 %s360_s9, 4  ;;  %p1983_p0 = pnand %p1447_p12, %p1960_p11  ;;  %s369_s26 = int_to_ptr.vmem [resolvable:$true] %s368_s26 }
  0x1f   : > { %s1988_s19 = scalar_lea.sflag [#allocation6], %s356_s30  ;;  %s2154_s4 = sld [smem:[#allocation27_spill]] }
  0x20   : > { %s2155_s1 = sld [smem:[#allocation25_spill]]  ;;  %s1353_s24 = sshll.u32 %s1828_s13, 6 }
  0x21   : > { %s2156_s9 = smov 4  }
  0x22   : > { %s364_s25 = scalar_lea.hbm %s2152_s3, %s1194_s18  ;;  %s378_s18 = scalar_lea.vmem [#allocation11], %s1969_s17 }
  0x23   : > { %s366_s0 = sshll.u32 %s364_s25, 4  ;;  %s386_s21 = sshll.u32 %s378_s18, 4  ;;  %s367_s0 = int_to_ptr.hbm [resolvable:$true] %s366_s0  ;;  %s387_s21 = int_to_ptr.vmem [resolvable:$true] %s386_s21 }
  0x24   : > { %1434 = dma.hbm_to_vmem [thread:$0]  (!%p1983_p0), %s367_s0, 32, %s369_s26, %s1988_s19  }
  0x25   : > { %s382_s25 = scalar_lea.hbm %s2154_s4, %s1828_s13  ;;  %s1837_s0 = smov [#allocation8]  }
  0x26   : > { %s384_s28 = sshll.u32 %s382_s25, 4  ;;  %s320_s27 = sshll.u32 %s2155_s1, 4  ;;  %s385_s28 = int_to_ptr.hbm [resolvable:$true] %s384_s28  ;;  %s321_s27 = int_to_ptr.hbm [resolvable:$true] %s320_s27 }
  0x27   : > { %1437 = dma.hbm_to_vmem [thread:$0]  (!%p1983_p0), %s385_s28, 16, %s387_s21, %s1988_s19  }
  0x28   : > { %s322_s26 = sshll.u32 %s1837_s0, 4  ;;  %s2157_s25 = smov 64   ;;  %s323_s26 = int_to_ptr.vmem [resolvable:$true] %s322_s26 }
  0x29   : > { %1427 = dma.hbm_to_vmem [thread:$0]  (!%p1944_p7), %s321_s27, 1024, %s323_s26, [#allocation9], %s2157_s25, %s2157_s25, %s2156_s9  }
  0x2a   : > { %s403_s4 = scalar_lea.hbm %s2128_s5, %s1353_s24  ;;  %s2158_s28 = sshll.u32 %s1969_s17, 6 }
  0x2b   : > { %s397_s21 = scalar_lea.vmem [#allocation12], %s2158_s28  ;;  %s404_s22 = sshll.u32 %s403_s4, 4  ;;  %s405_s22 = int_to_ptr.hbm [resolvable:$true] %s404_s22 }
  0x2c   : > { %s406_s30 = sshll.u32 %s397_s21, 4  ;;  %s337_s13 = sshll.u32 %s2130_s7, 4  ;;  %s407_s30 = int_to_ptr.vmem [resolvable:$true] %s406_s30  ;;  %s338_s13 = int_to_ptr.hbm [resolvable:$true] %s337_s13 }
  0x2d   : > { %1440 = dma.hbm_to_vmem [thread:$0]  (!%p1983_p0), %s405_s22, 1024, %s407_s30, %s1988_s19, %s2157_s25, %s2157_s25, %s2156_s9  }
  0x2e   : > { %s1838_s3 = smov [#allocation14]   ;;  %s427_s4 = scalar_lea.hbm %s2129_s6, %s1353_s24 }
  0x2f   : > { %s339_s27 = sshll.u32 %s1838_s3, 4  ;;  %s428_s28 = sshll.u32 %s427_s4, 4  ;;  %s340_s27 = int_to_ptr.vmem [resolvable:$true] %s339_s27  ;;  %s429_s28 = int_to_ptr.hbm [resolvable:$true] %s428_s28 }
  0x30   : > { %1430 = dma.hbm_to_vmem [thread:$0]  (!%p1944_p7), %s338_s13, 1024, %s340_s27, [#allocation9], %s2157_s25, %s2157_s25, %s2156_s9  }
  0x31   : > { %s2159_s1 = sshll.u32 %s1969_s17, 6  ;;  %442 = sbr.rel (%p1936_p5) target bundleno = 892 (0x37c), region = 56 }
  0x32   : > { %s420_s21 = scalar_lea.vmem [#allocation13], %s2159_s1 }
  0x33   : > { %s430_s0 = sshll.u32 %s420_s21, 4  ;;  %s431_s0 = int_to_ptr.vmem [resolvable:$true] %s430_s0 }
  0x34   : > { %1443 = dma.hbm_to_vmem [thread:$0]  (!%p1983_p0), %s429_s28, 1024, %s431_s0, %s1988_s19, %s2157_s25, %s2157_s25, %s2156_s9  }
  0x36   : > { %1791 = dma.done.wait (%p130_p1), [#allocation6], 128  }
  0x37   : > { %1793 = vsyncadd (%p130_p1), [#allocation6], 4294967168 }
  0x38   : > { %1795 = dma.done.wait (%p130_p1), [#allocation9], 1024  }
  0x39   : > { %1797 = vsyncadd (%p130_p1), [#allocation9], 4294966272  ;;  %s454_s13 = sand.u32 1, %s1921_s15   ;;  %s2052_s23 = sand.u32 1, %s1816_s10  }
  0x3a   : > { %s1204_s20 = sshll.u32 %s2052_s23, 1  ;;  %s455_s17 = scalar_lea.sflag [#allocation6], %s454_s13 }
  0x3b   : > { %s2055_s19 = scalar_lea.vmem [#allocation10], %s1204_s20 }
  0x3c   : > { %1799 = dma.done.wait (%p1929_p4), %s455_s17, 2096  }
  0x3d   : > { %1801 = vsyncadd (%p1929_p4), %s455_s17, 4294965200  ;;  %s1205_s29 = sshll.u32 %s2052_s23, 6  ;;  %s467_s24 = scalar_lea.vmem [#allocation11], %s2052_s23 }
  0x3e   : > { %s2063_s9 = scalar_lea.vmem [#allocation12], %s1205_s29  ;;  %s2065_s25 = scalar_lea.vmem [#allocation13], %s1205_s29 }
  0x3f   : > { %1803 = dma.done.wait (%p130_p1), [#allocation9], 1024  }
  0x40   : > { %1805 = vsyncadd (%p130_p1), [#allocation9], 4294966272  ;;  %p540_p2 = scmp.eq.s32.totalorder %s1824_s12, 0 }
  0x41   : > { %v1364_v0 = vld [vmem:[#allocation8 + $0x38] sm:$0xff] (%p540_p2)  ;;  %v1363_v1 = vld [vmem:[#allocation8 + $0x30] sm:$0xff] (%p540_p2)  ;;  %v1362_v2 = vld [vmem:[#allocation8 + $0x28] sm:$0xff] (%p540_p2) }
  0x42   : > { %545 = sbr.rel (!%p540_p2) target bundleno = 234 (0xea), region = 88  ;;  %622 = vmatpush.bf16.msra.mxu0 (%p540_p2), %v1364_v0  ;;  %v1361_v3 = vld [vmem:[#allocation8 + $0x20] sm:$0xff] (%p540_p2)  ;;  %v1360_v4 = vld [vmem:[#allocation8 + $0x18] sm:$0xff] (%p540_p2)  ;;  %v1359_v5 = vld [vmem:[#allocation8 + $0x10] sm:$0xff] (%p540_p2) }
  0x43   : > { %v1358_v6 = vld [vmem:[#allocation8 + $0x8] sm:$0xff] (%p540_p2)  ;;  %v1357_v7 = vld [vmem:[#allocation8] sm:$0xff] (%p540_p2)  ;;  %v1356_v8 = vld [vmem:[#allocation5] sm:$0xff] (%p540_p2) }
  0x44   : > { %v1510_v9 = vld [vmem:[%s2125_s2] ss:$0 sm:$0xff] (%p540_p2) }
  0x46   : > { %623 = vmatpush.bf16.msra.mxu0 (%p540_p2), %v1363_v1 }
  0x4a   : > { %624 = vmatpush.bf16.msra.mxu0 %v1362_v2 }
  0x4e   : > { %625 = vmatpush.bf16.msra.mxu0 %v1361_v3 }
  0x52   : > { %626 = vmatpush.bf16.msra.mxu0 %v1360_v4 }
  0x56   : > { %627 = vmatpush.bf16.msra.mxu0 %v1359_v5 }
  0x5a   : > { %628 = vmatpush.bf16.msra.mxu0 %v1358_v6 }
  0x5e   : > { %629 = vmatpush.bf16.msra.mxu0 %v1357_v7 }
  0x61   : > { %630 = vmatmul.bf16.vlgmr.msra.gmra.mxu0 %v1356_v8 }
  0xde   : > { %v631_v10 = vpop.f32.mrf.mxu0 }
  0xdf   : > { %v632_v11 = vadd.f32 %v1510_v9, %v631_v10 }
  0xe1   : > { %636 = vst [vmem:[#allocation2] sm:$0xff] %v632_v11 }
  0xe6   : > { %v633_v12 = vpop.f32.mrf.mxu0 }
  0xe7   : > { %v634_v13 = vadd.f32 %v1510_v9, %v633_v12 }
  0xe9   : > { %637 = vst [vmem:[#allocation2 + $0x8] sm:$0xff] %v634_v13 }
  0xea PF: > { %v641_v14 = vld [vmem:[#allocation2] sm:$0xff]  ;;  %v1373_v18 = vld [vmem:[%s2063_s9 + $0x38] sm:$0xff]  ;;  %v1370_v21 = vld [vmem:[%s2063_s9 + $0x20] sm:$0xff]  ;;  %p900_p1 = scmp.ne.s32.totalorder %s1824_s12, 4 }
  0xeb   : > { %v643_v15 = vmul.f32 %v641_v14, %v641_v14  ;;  %761 = vmatpush.bf16.msra.mxu0 %v1373_v18  ;;  %v1372_v19 = vld [vmem:[%s2063_s9 + $0x30] sm:$0xff]  ;;  %v1371_v20 = vld [vmem:[%s2063_s9 + $0x28] sm:$0xff]  ;;  %v1369_v22 = vld [vmem:[%s2063_s9 + $0x18] sm:$0xff] }
  0xec   : > { %v1368_v25 = vld [vmem:[%s2063_s9 + $0x10] sm:$0xff]  ;;  %v1367_v27 = vld [vmem:[%s2063_s9 + $0x8] sm:$0xff]  ;;  %v1366_v28 = vld [vmem:[%s2063_s9] sm:$0xff] }
  0xed   : > { %645 = vadd.xlane.f32.xlu0 %v643_v15  ;;  %v1511_v45 = vld [vmem:[%s2055_s19] ss:$0 sm:$0xff]  ;;  %v1380_v54 = vld [vmem:[%s2065_s25 + $0x30] sm:$0xff]  ;;  %v1379_v55 = vld [vmem:[%s2065_s25 + $0x28] sm:$0xff] }
  0xee   : > { %v1381_v53 = vld [vmem:[%s2065_s25 + $0x38] sm:$0xff]  ;;  %v1378_v56 = vld [vmem:[%s2065_s25 + $0x20] sm:$0xff]  ;;  %v1512_v58 = vld [vmem:[%s467_s24] ss:$0 sm:$0xff] }
  0xef   : > { %762 = vmatpush.bf16.msra.mxu0 %v1372_v19  ;;  %882 = vmatpush.bf16.msra.mxu1 %v1381_v53  ;;  %v1377_v57 = vld [vmem:[%s2065_s25 + $0x18] sm:$0xff]  ;;  %v1376_v59 = vld [vmem:[%s2065_s25 + $0x10] sm:$0xff]  ;;  %v1375_v62 = vld [vmem:[%s2065_s25 + $0x8] sm:$0xff] }
  0xf0   : > { %v642_v16 = vld [vmem:[#allocation2 + $0x8] sm:$0xff]  ;;  %v1374_v0 = vld [vmem:[%s2065_s25] sm:$0xff] }
  0xf1   : > { %v644_v17 = vmul.f32 %v642_v16, %v642_v16 }
  0xf3   : > { %763 = vmatpush.bf16.msra.mxu0 %v1371_v20  ;;  %883 = vmatpush.bf16.msra.mxu1 %v1380_v54 }
  0xf5   : > { %647 = vadd.xlane.f32.xlu0 %v644_v17 }
  0xf7   : > { %764 = vmatpush.bf16.msra.mxu0 %v1370_v21  ;;  %884 = vmatpush.bf16.msra.mxu1 %v1379_v55 }
  0xfb   : > { %765 = vmatpush.bf16.msra.mxu0 %v1369_v22  ;;  %885 = vmatpush.bf16.msra.mxu1 %v1378_v56 }
  0xff   : > { %766 = vmatpush.bf16.msra.mxu0 %v1368_v25  ;;  %886 = vmatpush.bf16.msra.mxu1 %v1377_v57 }
 0x103   : > { %767 = vmatpush.bf16.msra.mxu0 %v1367_v27  ;;  %887 = vmatpush.bf16.msra.mxu1 %v1376_v59 }
 0x107   : > { %768 = vmatpush.bf16.msra.mxu0 %v1366_v28  ;;  %888 = vmatpush.bf16.msra.mxu1 %v1375_v62 }
 0x10b   : > { %889 = vmatpush.bf16.msra.mxu1 %v1374_v0 }
 0x160   : > { %v646_v23 = vpop.xlane.xlu0 %645 }
 0x161   : > { %v649_v24 = vmul.f32 0.015625, %v646_v23 }
 0x163   : > { %v651_v26 = vadd.f32 1e-06, %v649_v24 }
 0x165   : > { %1513 = vrsqrt.f32 %v651_v26  ;;  %vm659_vm1 = vweird.f32 %v651_v26 }
 0x168   : > { %v648_v29 = vpop.xlane.xlu0 %647 }
 0x169   : > { %v650_v30 = vmul.f32 0.015625, %v648_v29 }
 0x16b   : > { %v1514_v31 = vpop.eup %1513  ;;  %v652_v32 = vadd.f32 1e-06, %v650_v30 }
 0x16c   : > { %v654_v33 = vmul.f32 %v1514_v31, %v651_v26  ;;  %vm660_vm0 = vweird.f32 %v1514_v31 }
 0x16d   : > { %1515 = vrsqrt.f32 %v652_v32  ;;  %vm661_vm2 = vmor %vm659_vm1, %vm660_vm0  ;;  %vm669_vm4 = vweird.f32 %v652_v32 }
 0x16e   : > { %v655_v34 = vmul.f32 %v1514_v31, %v654_v33  ;;  %v905_v33 = vld [vmem:[#allocation2] sm:$0xff] (%p900_p1) }
 0x170   : > { %v656_v35 = vmul.f32 0.5, %v655_v34 }
 0x172   : > { %v657_v36 = vsub.f32 1.5, %v656_v35 }
 0x173   : > { %v1516_v37 = vpop.eup %1515 }
 0x174   : > { %v664_v38 = vmul.f32 %v1516_v37, %v652_v32  ;;  %v658_v39 = vmul.f32 %v1514_v31, %v657_v36  ;;  %vm670_vm3 = vweird.f32 %v1516_v37  ;;  %v1525_v36 = vld [vmem:[%s2055_s19 + $0x1] ss:$0 sm:$0xff] (%p900_p1) }
 0x175   : > { %vm671_vm5 = vmor %vm669_vm4, %vm670_vm3 }
 0x176   : > { %v665_v40 = vmul.f32 %v1516_v37, %v664_v38  ;;  %v662_v42 = vsel %vm661_vm2, %v1514_v31, %v658_v39 }
 0x177   : > { %v673_v46 = vmul.f32 %v662_v42, %v641_v14 }
 0x178   : > { %v666_v41 = vmul.f32 0.5, %v665_v40 }
 0x179   : > { %v677_v49 = vmul.f32 %v1511_v45, %v673_v46 }
 0x17a   : > { %v667_v43 = vsub.f32 1.5, %v666_v41 }
 0x17c   : > { %v668_v44 = vmul.f32 %v1516_v37, %v667_v43 }
 0x17e   : > { %v672_v47 = vsel %vm671_vm5, %v1516_v37, %v668_v44  ;;  %v906_v37 = vld [vmem:[#allocation2 + $0x8] sm:$0xff] (%p900_p1) }
 0x17f   : > { %v674_v48 = vmul.f32 %v672_v47, %v642_v16 }
 0x181   : > { %v678_v50 = vmul.f32 %v1511_v45, %v674_v48 }
 0x183   : > { %v1395_v51 = vpack.c.bf16 %v678_v50, %v677_v49 }
 0x185   : > { %1396 = vst [vmem:[#allocation3] sm:$0xff] %v1395_v51  }
 0x18c   : > { %v1365_v52 = vld [vmem:[#allocation3] sm:$0xff] }
 0x18d   : > { %769 = vmatmul.bf16.vlgmr.msra.gmra.mxu0 %v1365_v52 }
 0x20a   : > { %v770_v60 = vpop.f32.mrf.mxu0 }
 0x20b   : > { %v771_v61 = vadd.f32 %v1512_v58, %v770_v60 }
 0x20d   : > { %v1281_v63 = vmul.f32 -1.442695, %v771_v61 }
 0x20f   : > { %1517 = vpow2.f32 %v1281_v63 }
 0x212   : > { %v772_v1 = vpop.f32.mrf.mxu0 }
 0x213   : > { %v773_v2 = vadd.f32 %v1512_v58, %v772_v1 }
 0x215   : > { %v1518_v3 = vpop.eup %1517  ;;  %v1282_v4 = vmul.f32 -1.442695, %v773_v2 }
 0x216   : > { %v781_v5 = vadd.f32 1.0, %v1518_v3 }
 0x217   : > { %1519 = vpow2.f32 %v1282_v4 }
 0x218   : > { %1521 = vrcp.f32 %v781_v5  ;;  %v794_v15 = vand.u32 2147483648, %v781_v5  ;;  %vm788_vm7 = vweird.f32 %v781_v5  ;;  %v792_v16 = vand.u32 2147483647, %v781_v5 }
 0x21a   : > { %v795_v22 = vor.u32 1.1754944e-38, %v794_v15  ;;  %vm793_vm10 = vcmp.eq.f32.partialorder %v792_v16, 8.507059e+37 }
 0x21d   : > { %v1520_v6 = vpop.eup %1519 }
 0x21e   : > { %v1522_v7 = vpop.eup %1521  ;;  %v782_v8 = vadd.f32 1.0, %v1520_v6 }
 0x21f   : > { %v784_v9 = vmul.f32 %v1522_v7, %v781_v5  ;;  %vm789_vm6 = vweird.f32 %v1522_v7 }
 0x220   : > { %1523 = vrcp.f32 %v782_v8  ;;  %vm790_vm8 = vmor %vm788_vm7, %vm789_vm6  ;;  %v809_v18 = vand.u32 2147483648, %v782_v8  ;;  %v807_v21 = vand.u32 2147483647, %v782_v8  ;;  %vm803_vm11 = vweird.f32 %v782_v8 }
 0x221   : > { %v785_v10 = vsub.f32 1.0, %v784_v9 }
 0x222   : > { %v810_v25 = vor.u32 1.1754944e-38, %v809_v18  ;;  %vm808_vm13 = vcmp.eq.f32.partialorder %v807_v21, 8.507059e+37 }
 0x223   : > { %v786_v11 = vmul.f32 %v1522_v7, %v785_v10 }
 0x225   : > { %v787_v13 = vadd.f32 %v1522_v7, %v786_v11 }
 0x226   : > { %v1524_v12 = vpop.eup %1523 }
 0x227   : > { %v799_v14 = vmul.f32 %v1524_v12, %v782_v8  ;;  %v791_v19 = vsel %vm790_vm8, %v1522_v7, %v787_v13  ;;  %vm804_vm9 = vweird.f32 %v1524_v12 }
 0x228   : > { %v796_v24 = vsel %vm793_vm10, %v795_v22, %v791_v19  ;;  %vm805_vm12 = vmor %vm803_vm11, %vm804_vm9 }
 0x229   : > { %v800_v17 = vsub.f32 1.0, %v799_v14  ;;  %v813_v28 = vmul.f32 %v796_v24, %v771_v61 }
 0x22b   : > { %v801_v20 = vmul.f32 %v1524_v12, %v800_v17 }
 0x22d   : > { %v802_v23 = vadd.f32 %v1524_v12, %v801_v20 }
 0x22f   : > { %v806_v26 = vsel %vm805_vm12, %v1524_v12, %v802_v23 }
 0x230   : > { %v811_v27 = vsel %vm808_vm13, %v810_v25, %v806_v26 }
 0x231   : > { %v814_v29 = vmul.f32 %v811_v27, %v773_v2 }
 0x233   : > { %v817_v30 = vpack.c.bf16 %v814_v29, %v813_v28 }
 0x235   : > { %890 = vmatmul.bf16.vlgmr.msra.gmra.mxu1 %v817_v30 }
 0x2b2   : > { %v891_v31 = vpop.f32.mrf.mxu1 }
 0x2b3   : > { %898 = vst [vmem:[#allocation4 + $0x8] sm:$0xff] %v891_v31 }
 0x2b7   : > { %904 = sbr.rel (!%p900_p1) target bundleno = 712 (0x2c8), region = 96 }
 0x2ba   : > { %v893_v32 = vpop.f32.mrf.mxu1  ;;  %v907_v34 = vld [vmem:[#allocation4 + $0x8] sm:$0xff] (%p900_p1) }
 0x2bb   : > { %899 = vst [vmem:[#allocation4] sm:$0xff] %v893_v32  ;;  %v909_v35 = vadd.f32 (%p900_p1), %v907_v34, %v905_v33 }
 0x2bd   : > { %v913_v40 = vadd.f32 %v1525_v36, %v909_v35 }
 0x2bf   : > { %915 = vst [vmem:[#allocation2] sm:$0xff] %v913_v40 }
 0x2c2   : > { %v908_v38 = vld [vmem:[#allocation4] sm:$0xff] }
 0x2c3   : > { %v910_v39 = vadd.f32 %v908_v38, %v906_v37 }
 0x2c5   : > { %v914_v41 = vadd.f32 %v1525_v36, %v910_v39 }
 0x2c7   : > { %916 = vst [vmem:[#allocation2 + $0x8] sm:$0xff] %v914_v41 }
 0x2c8 PF: > { %p917_p3 = scmp.eq.s32.totalorder %s1824_s12, 4 }
 0x2c9   : > { %v1391_v42 = vld [vmem:[#allocation14 + $0x38] sm:$0xff] (%p917_p3)  ;;  %v1390_v43 = vld [vmem:[#allocation14 + $0x30] sm:$0xff] (%p917_p3)  ;;  %v1389_v44 = vld [vmem:[#allocation14 + $0x28] sm:$0xff] (%p917_p3) }
 0x2ca   : > { %921 = sbr.rel (!%p917_p3) target bundleno = 882 (0x372), region = 100  ;;  %1001 = vmatpush.bf16.msra.mxu0 (%p917_p3), %v1391_v42  ;;  %v1388_v45 = vld [vmem:[#allocation14 + $0x20] sm:$0xff] (%p917_p3)  ;;  %v1387_v46 = vld [vmem:[#allocation14 + $0x18] sm:$0xff] (%p917_p3)  ;;  %v1386_v47 = vld [vmem:[#allocation14 + $0x10] sm:$0xff] (%p917_p3) }
 0x2cb   : > { %v922_v48 = vld [vmem:[#allocation2] sm:$0xff] (%p917_p3)  ;;  %v1526_v54 = vld [vmem:[%s2055_s19 + $0x1] ss:$0 sm:$0xff] (%p917_p3)  ;;  %v1384_v58 = vld [vmem:[#allocation14] sm:$0xff] (%p917_p3) }
 0x2cc   : > { %v924_v50 = vld [vmem:[#allocation4 + $0x8] sm:$0xff] (%p917_p3) }
 0x2cd   : > { %v926_v52 = vadd.f32 (%p917_p3), %v924_v50, %v922_v48  ;;  %v1385_v55 = vld [vmem:[#allocation14 + $0x8] sm:$0xff] (%p917_p3) }
 0x2ce   : > { %1002 = vmatpush.bf16.msra.mxu0 (%p917_p3), %v1390_v43  ;;  %v923_v49 = vld [vmem:[#allocation2 + $0x8] sm:$0xff] (%p917_p3)  ;;  %v925_v51 = vld [vmem:[#allocation4] sm:$0xff] (%p917_p3)  ;;  %v1527_v60 = vld [vmem:[%s2131_s8] ss:$0 sm:$0xff] (%p917_p3) }
 0x2cf   : > { %v927_v53 = vadd.f32 %v925_v51, %v923_v49  ;;  %v930_v56 = vadd.f32 %v1526_v54, %v926_v52 }
 0x2d1   : > { %v931_v57 = vadd.f32 %v1526_v54, %v927_v53 }
 0x2d2   : > { %1003 = vmatpush.bf16.msra.mxu0 %v1389_v44 }
 0x2d3   : > { %v932_v59 = vpack.c.bf16 %v931_v57, %v930_v56 }
 0x2d6   : > { %1004 = vmatpush.bf16.msra.mxu0 %v1388_v45 }
 0x2da   : > { %1005 = vmatpush.bf16.msra.mxu0 %v1387_v46 }
 0x2de   : > { %1006 = vmatpush.bf16.msra.mxu0 %v1386_v47 }
 0x2e2   : > { %1007 = vmatpush.bf16.msra.mxu0 %v1385_v55 }
 0x2e6   : > { %1008 = vmatpush.bf16.msra.mxu0 %v1384_v58 }
 0x2e9   : > { %1009 = vmatmul.bf16.vlgmr.msra.gmra.mxu0 %v932_v59 }
 0x366   : > { %v1010_v61 = vpop.f32.mrf.mxu0 }
 0x367   : > { %v1011_v62 = vadd.f32 %v1527_v60, %v1010_v61 }
 0x369   : > { %1015 = vst [vmem:[#allocation15] sm:$0xff] %v1011_v62 }
 0x36e   : > { %v1012_v63 = vpop.f32.mrf.mxu0 }
 0x36f   : > { %v1013_v0 = vadd.f32 %v1527_v60, %v1012_v63 }
 0x371   : > { %1016 = vst [vmem:[#allocation15 + $0x8] sm:$0xff] %v1013_v0 }
 0x372 PF: > { %p1451_p4 = scmp.eq.s32.totalorder %s1921_s15, 4  ;;  %s2160_s26 = sld [smem:[#allocation28_spill]] }
 0x373   : > { %s1839_s4 = smov [#allocation15]   ;;  %s1840_s1 = smov 128  }
 0x374   : > { %s1025_s28 = sshll.u32 %s1839_s4, 4  ;;  %s1841_s21 = smov 8   ;;  %s1026_s28 = int_to_ptr.vmem [resolvable:$true] %s1025_s28 }
 0x378   : > { %s1027_s18 = sshll.u32 %s2160_s26, 4  ;;  %s1028_s18 = int_to_ptr.hbm [resolvable:$true] %s1027_s18 }
 0x379   : > { %1418 = dma.vmem_to_hbm [thread:$0]  (%p1451_p4), %s1026_s28, 256, %s1028_s18, [#allocation7], %s1840_s1, %s1840_s1, %s1841_s21  }
 0x37a   : > { %1807 = dma.done.wait (%p1451_p4), [#allocation7], 256  }
 0x37b   : > { %1809 = vsyncadd (%p1451_p4), [#allocation7], 4294967040 }
 0x37c PF: > { %s22_s14 = sadd.s32 1, %s1832_s14   ;;  %s2161_s15 = sld [smem:[#allocation23_spill]] }
 0x37d   : > { %p19_p5 = scmp.ge.s32.totalorder %s22_s14, 7   ;;  %s2162_s12 = sld [smem:[#allocation21_spill]] }
 0x37e   : > { %s2163_s13 = sld [smem:[#allocation22_spill]]  ;;  %s2164_s30 = smov %s1816_s10 }
 0x37f   : > { %s2165_s10 = smov %s1820_s11  ;;  %21 = sbr.rel (!%p19_p5) target bundleno = 11 (0xb), region = 155 }
 0x382   : > { %s2166_s11 = smov %s2161_s15 }
 0x384   :  { %1044 = vsyncpa [#allocation6], 1 }
 0x385   :  { %1046 = vsyncpa [#allocation6 + $0x1], 1 }
 0x386   :  { %1047 = vsyncpa [#allocation9], 1 }
 0x387   :  { %1048 = vsyncpa [#allocation7], 1 }
 0x388   :  { %1050 = vsyncpa [#allocation7 + $0x1], 1 }

</bundles_post_ra>
